<compile_context>
chip_gen: v6e
topology: v6e:2x2x1
jax: 0.10.0
libtpu: 0.0.40
codegen_flags: <defaults>
</compile_context>

<pallas_src>
import jax
import jax.numpy as jnp
from jax.experimental import pallas as pl
from jax.experimental.pallas import tpu as pltpu

BN_EPS = 1e-5
_VMEM_LIMIT = 48 * 1024 * 1024  # above v5e/v6e scoped defaults, below v7x 64 MiB physical


# ----------------------------------------------------------------------------
# Kernel 1: Linear(D->H, no bias) + BatchNorm1d(H) (affine) + ReLU, both views.
#   x      : (2B, D)  f32   (view-0 rows then view-1 rows)   -- resident
#   W1     : (D, tn)  f32   column slab for grid step j
#   g1, b1 : (1, tn)  f32   BatchNorm1d affine params, matching column slab
#   h      : (2B, tn) bf16  output column slab
# Grid: (H // tn,), "parallel" (steps fully independent).
# ----------------------------------------------------------------------------
def _linear1_bn_relu_kernel(x_ref, w1_ref, g1_ref, b1_ref, h_ref):
    B = x_ref.shape[0] // 2

    # h_slab = x @ W1[:, slab]   (bf16 operands, f32 accumulation on the MXU)
    hs = jnp.dot(x_ref[...].astype(jnp.bfloat16),
                 w1_ref[...].astype(jnp.bfloat16),
                 preferred_element_type=jnp.float32)              # (2B, tn) f32

    # BatchNorm1d in training mode (batch stats, biased var) + affine + ReLU,
    # computed per view; stats are per-feature over the batch so column tiling is exact.
    def bn_affine_relu(hv):
        m = jnp.mean(hv, axis=0, keepdims=True)
        v = jnp.mean((hv - m) ** 2, axis=0, keepdims=True)
        hv = (hv - m) * jax.lax.rsqrt(v + BN_EPS)
        hv = hv * g1_ref[...] + b1_ref[...]
        return jnp.maximum(hv, 0.0)

    h_ref[0:B, :] = bn_affine_relu(hs[:B]).astype(jnp.bfloat16)
    h_ref[B:, :] = bn_affine_relu(hs[B:]).astype(jnp.bfloat16)


# ----------------------------------------------------------------------------
# Kernel 2: Linear(H->H, no bias) + BatchNorm1d(H, affine=False), both views.
#   h  : (2B, H)  bf16  -- resident
#   W2 : (H, tn)  f32   column slab for grid step j
#   zn : (2B, tn) bf16  output column slab (normalized embeddings)
# Grid: (H // tn,), "parallel".
# ----------------------------------------------------------------------------
def _linear2_bn_kernel(h_ref, w2_ref, zn_ref):
    B = h_ref.shape[0] // 2

    z = jnp.dot(h_ref[...], w2_ref[...].astype(jnp.bfloat16),
                preferred_element_type=jnp.float32)               # (2B, tn) f32

    def bn_noaffine(zv):
        m = jnp.mean(zv, axis=0, keepdims=True)
        v = jnp.mean((zv - m) ** 2, axis=0, keepdims=True)
        return (zv - m) * jax.lax.rsqrt(v + BN_EPS)

    zn_ref[0:B, :] = bn_noaffine(z[:B]).astype(jnp.bfloat16)
    zn_ref[B:, :] = bn_noaffine(z[B:]).astype(jnp.bfloat16)


def projector_bn(features, w1, g1, b1, w2, tn=None):
    """features: (B, 2, D) f32 -> zn: (2B, H) bf16 (view-0 rows then view-1 rows, BN-normalized)."""
    B, two, D = features.shape
    assert two == 2 and B % 8 == 0
    H = w1.shape[1]
    if tn is None:
        tn = min(H, 512)
    assert H % tn == 0 and tn % 128 == 0

    # Layout plumbing only: stack the two views so one matmul M-dim covers both.
    x = features.transpose(1, 0, 2).reshape(2 * B, D)
    grid = (H // tn,)

    h = pl.pallas_call(
        _linear1_bn_relu_kernel,
        out_shape=jax.ShapeDtypeStruct((2 * B, H), jnp.bfloat16),
        grid_spec=pltpu.PrefetchScalarGridSpec(
            num_scalar_prefetch=0,
            grid=grid,
            in_specs=[
                pl.BlockSpec((2 * B, D), lambda j: (0, 0)),     # x (resident)
                pl.BlockSpec((D, tn), lambda j: (0, j)),        # W1 column slab
                pl.BlockSpec((1, tn), lambda j: (0, j)),        # gamma slab
                pl.BlockSpec((1, tn), lambda j: (0, j)),        # beta slab
            ],
            out_specs=pl.BlockSpec((2 * B, tn), lambda j: (0, j)),
        ),
        compiler_params=pltpu.CompilerParams(
            dimension_semantics=("parallel",),
            vmem_limit_bytes=_VMEM_LIMIT),
    )(x, w1, g1, b1)

    zn = pl.pallas_call(
        _linear2_bn_kernel,
        out_shape=jax.ShapeDtypeStruct((2 * B, H), jnp.bfloat16),
        grid_spec=pltpu.PrefetchScalarGridSpec(
            num_scalar_prefetch=0,
            grid=grid,
            in_specs=[
                pl.BlockSpec((2 * B, H), lambda j: (0, 0)),     # h (resident, bf16)
                pl.BlockSpec((H, tn), lambda j: (0, j)),        # W2 column slab
            ],
            out_specs=pl.BlockSpec((2 * B, tn), lambda j: (0, j)),
        ),
        compiler_params=pltpu.CompilerParams(
            dimension_semantics=("parallel",),
            vmem_limit_bytes=_VMEM_LIMIT),
    )(h, w2)

    return zn


# ----------------------------------------------------------------------------
# Kernel 3: cross-correlation partials.  Grid step i computes the (tn, H) row-slab
#   c[i*tn:(i+1)*tn, :] = zn1[:, i-block].T @ zn2
# and emits lane-dense partials:
#   diag_ref  : the tn diagonal entries of c in this slab           -> (1, tn)
#   colsq_ref : per-column sums of c^2 over the slab                -> (1, 1, H)
# The scalar lambda-combine happens in the wrapper, so the grid axis stays
# "parallel" (megacore-friendly on v7x) and no accumulators are carried.
# ----------------------------------------------------------------------------
def _loss_partial_kernel(zn1_ref, zn2_ref, diag_ref, colsq_ref):
    i = pl.program_id(0)
    tn = zn1_ref.shape[1]

    a = zn1_ref[...]                                   # (B, tn) bf16 column slab of zn1
    b = zn2_ref[...]                                   # (B, H)  bf16 (resident)

    # (tn, H) slab of c = zn1.T @ zn2 : contract over the batch axis on the MXU.
    c = jax.lax.dot_general(
        a, b, dimension_numbers=(((0,), (0,)), ((), ())),
        preferred_element_type=jnp.float32)

    colsq_ref[0] = jnp.sum(c * c, axis=0, keepdims=True)           # (1, H)

    # Diagonal entries of this slab live in columns [i*tn, i*tn+tn): compute them
    # directly as an elementwise product-sum (no iota masks, no diagonal gather).
    col0 = pl.multiple_of(i * tn, 128)
    b_diag = zn2_ref[:, pl.ds(col0, tn)]                           # (B, tn) bf16
    diag_ref[...] = jnp.sum(a.astype(jnp.float32) * b_diag.astype(jnp.float32),
                            axis=0, keepdims=True)                 # (1, tn)


def barlow_loss(zn, lambd, tn=None):
    """zn: (2B, H) bf16 (view-0 rows then view-1 rows) -> scalar Barlow Twins loss (f32)."""
    two_b, H = zn.shape
    B = two_b // 2
    if tn is None:
        tn = min(H, 512)
    assert H % tn == 0 and tn % 128 == 0
    n_i = H // tn

    diag, colsq = pl.pallas_call(
        _loss_partial_kernel,
        out_shape=(jax.ShapeDtypeStruct((1, H), jnp.float32),
                   jax.ShapeDtypeStruct((n_i, 1, H), jnp.float32)),
        grid_spec=pltpu.PrefetchScalarGridSpec(
            num_scalar_prefetch=0,
            grid=(n_i,),
            in_specs=[
                pl.BlockSpec((B, tn), lambda i: (0, i)),     # zn1 column slab (rows 0:B)
                pl.BlockSpec((B, H), lambda i: (1, 0)),      # zn2 full (rows B:2B, resident)
            ],
            out_specs=[
                pl.BlockSpec((1, tn), lambda i: (0, i)),
                pl.BlockSpec((1, 1, H), lambda i: (i, 0, 0)),
            ],
        ),
        compiler_params=pltpu.CompilerParams(
            dimension_semantics=("parallel",),
            vmem_limit_bytes=_VMEM_LIMIT),
    )(zn, zn)

    d = diag.reshape(-1)                                   # (H,) diagonal of c
    on_diag = jnp.sum((d - 1.0) ** 2)
    off_diag = jnp.sum(colsq) - jnp.sum(d * d)
    # 1/256 scaling is verbatim from the PyTorch module (not 1/B).
    return (on_diag + lambd * off_diag) * (1.0 / 256.0)


def barlow_twins_forward(features, w1, g1, b1, w2, lambd, tn_h=None, tn_loss=None):
    """features: (B, 2, D) f32 -> scalar loss (f32)."""
    zn = projector_bn(features, w1, g1, b1, w2, tn=tn_h)
    return barlow_loss(zn, lambd, tn=tn_loss)


# ----------------------------------------------------------------------------
# Pure-JAX references for correctness checking.
# ----------------------------------------------------------------------------
def reference_loss_f32(features, w1, g1, b1, w2, lambd):
    def proj_bn(x):
        h = jnp.dot(x, w1, precision="highest")
        m = jnp.mean(h, 0, keepdims=True)
        v = jnp.mean((h - m) ** 2, 0, keepdims=True)
        h = (h - m) * jax.lax.rsqrt(v + BN_EPS) * g1 + b1
        h = jnp.maximum(h, 0.0)
        z = jnp.dot(h, w2, precision="highest")
        m2 = jnp.mean(z, 0, keepdims=True)
        v2 = jnp.mean((z - m2) ** 2, 0, keepdims=True)
        return (z - m2) * jax.lax.rsqrt(v2 + BN_EPS)

    zn1 = proj_bn(features[:, 0, :])
    zn2 = proj_bn(features[:, 1, :])
    c = jnp.dot(zn1.T, zn2, precision="highest")
    d = jnp.diagonal(c)
    on = jnp.sum((d - 1.0) ** 2) * (1.0 / 256.0)
    off = (jnp.sum(c ** 2) - jnp.sum(d ** 2)) * (1.0 / 256.0)
    return on + lambd * off


def reference_loss_bf16(features, w1, g1, b1, w2, lambd):
    # Emulates the kernel's mixed precision: bf16 MXU operands, f32 accumulation,
    # f32 BN math, bf16 h / zn storage.
    bf16 = jnp.bfloat16

    def proj_bn(x):
        h = jnp.dot(x.astype(bf16), w1.astype(bf16), preferred_element_type=jnp.float32)
        m = jnp.mean(h, 0, keepdims=True)
        v = jnp.mean((h - m) ** 2, 0, keepdims=True)
        h = (h - m) * jax.lax.rsqrt(v + BN_EPS) * g1 + b1
        h = jnp.maximum(h, 0.0).astype(bf16)
        z = jnp.dot(h, w2.astype(bf16), preferred_element_type=jnp.float32)
        m2 = jnp.mean(z, 0, keepdims=True)
        v2 = jnp.mean((z - m2) ** 2, 0, keepdims=True)
        return ((z - m2) * jax.lax.rsqrt(v2 + BN_EPS)).astype(bf16)

    zn1 = proj_bn(features[:, 0, :])
    zn2 = proj_bn(features[:, 1, :])
    c = jnp.dot(zn1.T, zn2, preferred_element_type=jnp.float32)
    d = jnp.diagonal(c)
    on = jnp.sum((d - 1.0) ** 2) * (1.0 / 256.0)
    off = (jnp.sum(c ** 2) - jnp.sum(d ** 2)) * (1.0 / 256.0)
    return on + lambd * off


if __name__ == "__main__":
    key = jax.random.PRNGKey(0)
    B, D, H = 8, 32, 256          # batch, model_dim, projector width (small demo sizes)
    lambd = 0.0051                # standard Barlow Twins lambda

    k_feat, k_w1, k_w2 = jax.random.split(key, 3)
    features = jax.random.normal(k_feat, (B, 2, D), dtype=jnp.float32)

    # nn.Linear-style init: uniform(-1/sqrt(fan_in), 1/sqrt(fan_in)); BN gamma=1, beta=0.
    bound1 = 1.0 / (D ** 0.5)
    bound2 = 1.0 / (H ** 0.5)
    w1 = jax.random.uniform(k_w1, (D, H), jnp.float32, -bound1, bound1)
    w2 = jax.random.uniform(k_w2, (H, H), jnp.float32, -bound2, bound2)
    g1 = jnp.ones((1, H), jnp.float32)
    b1 = jnp.zeros((1, H), jnp.float32)

    # Small tiles (128) are passed explicitly so the demo exercises multi-step grids;
    # the defaults (min(H, 512)) target realistic H=4096 shapes.
    loss = barlow_twins_forward(features, w1, g1, b1, w2, lambd, tn_h=128, tn_loss=128)
    loss = jax.block_until_ready(loss)

    ref_bf16 = jax.block_until_ready(reference_loss_bf16(features, w1, g1, b1, w2, lambd))
    ref_f32 = jax.block_until_ready(reference_loss_f32(features, w1, g1, b1, w2, lambd))

    assert jnp.isfinite(loss), "kernel produced non-finite loss"
    # Tight check against a reference using the same mixed precision as the kernel.
    assert jnp.allclose(loss, ref_bf16, rtol=1e-2, atol=1e-2), (float(loss), float(ref_bf16))
    # Loose sanity check against the full-f32 reference (bf16 MXU path vs precision="highest").
    assert jnp.allclose(loss, ref_f32, rtol=1.5e-1, atol=1e-1), (float(loss), float(ref_f32))

    print("KERNEL_OK")
</pallas_src>

<mosaic_0001>
module attributes {stable_mosaic.version = 11 : i64} {
  func.func @_linear1_bn_relu_kernel(%arg0: i32, %arg1: memref<16x32xf32, #tpu.memory_space<vmem>>, %arg2: memref<32x128xf32, #tpu.memory_space<vmem>>, %arg3: memref<1x128xf32, #tpu.memory_space<vmem>>, %arg4: memref<1x128xf32, #tpu.memory_space<vmem>>, %arg5: memref<16x128xbf16, #tpu.memory_space<vmem>>) attributes {dimension_semantics = [#tpu.dimension_semantics<parallel>], iteration_bounds = array<i64: 2>, scalar_prefetch = 0 : i64, scratch_operands = 0 : i64, tpu.core_type = #tpu.core_type<tc>, window_params = [{pipeline_mode = #tpu.pipeline_mode<synchronous>, transform_indices = @transform_0, window_bounds = array<i64: 16, 32>}, {transform_indices = @transform_1, window_bounds = array<i64: 32, 128>}, {transform_indices = @transform_2, window_bounds = array<i64: 1, 128>}, {transform_indices = @transform_3, window_bounds = array<i64: 1, 128>}, {transform_indices = @transform_4, window_bounds = array<i64: 16, 128>}]} {
    %c0 = arith.constant 0 : index
    %c0_0 = arith.constant 0 : index
    %0 = vector.load %arg1[%c0, %c0_0] : memref<16x32xf32, #tpu.memory_space<vmem>>, vector<16x32xf32>
    %1 = arith.truncf %0 : vector<16x32xf32> to vector<16x32xbf16>
    %c0_1 = arith.constant 0 : index
    %c0_2 = arith.constant 0 : index
    %2 = vector.load %arg2[%c0_1, %c0_2] : memref<32x128xf32, #tpu.memory_space<vmem>>, vector<32x128xf32>
    %3 = arith.truncf %2 : vector<32x128xf32> to vector<32x128xbf16>
    %cst = arith.constant dense<0.000000e+00> : vector<16x128xf32>
    %4 = tpu.matmul %1, %3, %cst {dimension_numbers = #tpu.dot_dimension_numbers<[1], [0], [0], [1], [0, 0, 1, 1], [], []>} : vector<16x32xbf16>, vector<32x128xbf16>, vector<16x128xf32> -> vector<16x128xf32>
    %5 = vector.extract_strided_slice %4 {offsets = [0, 0], sizes = [8, 128], strides = [1, 1]} : vector<16x128xf32> to vector<8x128xf32>
    %cst_3 = arith.constant dense<0.000000e+00> : vector<128xf32>
    %6 = vector.multi_reduction <add>, %5, %cst_3 [0] : vector<8x128xf32> to vector<128xf32>
    %7 = vector.shape_cast %6 : vector<128xf32> to vector<1x128xf32>
    %cst_4 = arith.constant 8.000000e+00 : f32
    %8 = vector.broadcast %cst_4 : f32 to vector<1x128xf32>
    %9 = arith.divf %7, %8 : vector<1x128xf32>
    %10 = vector.broadcast %9 : vector<1x128xf32> to vector<8x128xf32>
    %11 = arith.subf %5, %10 : vector<8x128xf32>
    %12 = arith.mulf %11, %11 : vector<8x128xf32>
    %cst_5 = arith.constant dense<0.000000e+00> : vector<128xf32>
    %13 = vector.multi_reduction <add>, %12, %cst_5 [0] : vector<8x128xf32> to vector<128xf32>
    %14 = vector.shape_cast %13 : vector<128xf32> to vector<1x128xf32>
    %cst_6 = arith.constant 8.000000e+00 : f32
    %15 = vector.broadcast %cst_6 : f32 to vector<1x128xf32>
    %16 = arith.divf %14, %15 : vector<1x128xf32>
    %17 = vector.broadcast %9 : vector<1x128xf32> to vector<8x128xf32>
    %18 = arith.subf %5, %17 : vector<8x128xf32>
    %cst_7 = arith.constant 9.99999974E-6 : f32
    %19 = vector.broadcast %cst_7 : f32 to vector<1x128xf32>
    %20 = arith.addf %16, %19 : vector<1x128xf32>
    %21 = math.rsqrt %20 : vector<1x128xf32>
    %22 = vector.broadcast %21 : vector<1x128xf32> to vector<8x128xf32>
    %23 = arith.mulf %18, %22 : vector<8x128xf32>
    %c0_8 = arith.constant 0 : index
    %c0_9 = arith.constant 0 : index
    %24 = vector.load %arg3[%c0_8, %c0_9] : memref<1x128xf32, #tpu.memory_space<vmem>>, vector<1x128xf32>
    %25 = vector.broadcast %24 : vector<1x128xf32> to vector<8x128xf32>
    %26 = arith.mulf %23, %25 : vector<8x128xf32>
    %c0_10 = arith.constant 0 : index
    %c0_11 = arith.constant 0 : index
    %27 = vector.load %arg4[%c0_10, %c0_11] : memref<1x128xf32, #tpu.memory_space<vmem>>, vector<1x128xf32>
    %28 = vector.broadcast %27 : vector<1x128xf32> to vector<8x128xf32>
    %29 = arith.addf %26, %28 : vector<8x128xf32>
    %cst_12 = arith.constant 0.000000e+00 : f32
    %30 = vector.broadcast %cst_12 : f32 to vector<8x128xf32>
    %31 = arith.maximumf %29, %30 : vector<8x128xf32>
    %32 = arith.truncf %31 : vector<8x128xf32> to vector<8x128xbf16>
    %c0_13 = arith.constant 0 : index
    %c0_14 = arith.constant 0 : index
    %33 = vector.load %arg5[%c0_13, %c0_14] : memref<16x128xbf16, #tpu.memory_space<vmem>>, vector<8x128xbf16>
    tpu.vector_store %arg5[%c0_13, %c0_14], %32 {strides = array<i32>} : memref<16x128xbf16, #tpu.memory_space<vmem>>, vector<8x128xbf16>,
    %34 = vector.extract_strided_slice %4 {offsets = [8, 0], sizes = [8, 128], strides = [1, 1]} : vector<16x128xf32> to vector<8x128xf32>
    %cst_15 = arith.constant dense<0.000000e+00> : vector<128xf32>
    %35 = vector.multi_reduction <add>, %34, %cst_15 [0] : vector<8x128xf32> to vector<128xf32>
    %36 = vector.shape_cast %35 : vector<128xf32> to vector<1x128xf32>
    %cst_16 = arith.constant 8.000000e+00 : f32
    %37 = vector.broadcast %cst_16 : f32 to vector<1x128xf32>
    %38 = arith.divf %36, %37 : vector<1x128xf32>
    %39 = vector.broadcast %38 : vector<1x128xf32> to vector<8x128xf32>
    %40 = arith.subf %34, %39 : vector<8x128xf32>
    %41 = arith.mulf %40, %40 : vector<8x128xf32>
    %cst_17 = arith.constant dense<0.000000e+00> : vector<128xf32>
    %42 = vector.multi_reduction <add>, %41, %cst_17 [0] : vector<8x128xf32> to vector<128xf32>
    %43 = vector.shape_cast %42 : vector<128xf32> to vector<1x128xf32>
    %cst_18 = arith.constant 8.000000e+00 : f32
    %44 = vector.broadcast %cst_18 : f32 to vector<1x128xf32>
    %45 = arith.divf %43, %44 : vector<1x128xf32>
    %46 = vector.broadcast %38 : vector<1x128xf32> to vector<8x128xf32>
    %47 = arith.subf %34, %46 : vector<8x128xf32>
    %cst_19 = arith.constant 9.99999974E-6 : f32
    %48 = vector.broadcast %cst_19 : f32 to vector<1x128xf32>
    %49 = arith.addf %45, %48 : vector<1x128xf32>
    %50 = math.rsqrt %49 : vector<1x128xf32>
    %51 = vector.broadcast %50 : vector<1x128xf32> to vector<8x128xf32>
    %52 = arith.mulf %47, %51 : vector<8x128xf32>
    %c0_20 = arith.constant 0 : index
    %c0_21 = arith.constant 0 : index
    %53 = vector.load %arg3[%c0_20, %c0_21] : memref<1x128xf32, #tpu.memory_space<vmem>>, vector<1x128xf32>
    %54 = vector.broadcast %53 : vector<1x128xf32> to vector<8x128xf32>
    %55 = arith.mulf %52, %54 : vector<8x128xf32>
    %c0_22 = arith.constant 0 : index
    %c0_23 = arith.constant 0 : index
    %56 = vector.load %arg4[%c0_22, %c0_23] : memref<1x128xf32, #tpu.memory_space<vmem>>, vector<1x128xf32>
    %57 = vector.broadcast %56 : vector<1x128xf32> to vector<8x128xf32>
    %58 = arith.addf %55, %57 : vector<8x128xf32>
    %cst_24 = arith.constant 0.000000e+00 : f32
    %59 = vector.broadcast %cst_24 : f32 to vector<8x128xf32>
    %60 = arith.maximumf %58, %59 : vector<8x128xf32>
    %61 = arith.truncf %60 : vector<8x128xf32> to vector<8x128xbf16>
    %c8 = arith.constant 8 : index
    %c0_25 = arith.constant 0 : index
    %62 = vector.load %arg5[%c8, %c0_25] : memref<16x128xbf16, #tpu.memory_space<vmem>>, vector<8x128xbf16>
    tpu.vector_store %arg5[%c8, %c0_25], %61 {strides = array<i32>} : memref<16x128xbf16, #tpu.memory_space<vmem>>, vector<8x128xbf16>,
    return
  }
  func.func @transform_0(%arg0: i32) -> (i32, i32) {
    %c0_i32 = arith.constant 0 : i32
    %c0_i32_0 = arith.constant 0 : i32
    %c0_i32_1 = arith.constant 0 : i32
    return %c0_i32, %c0_i32_0 : i32, i32
  }
  func.func @transform_1(%arg0: i32) -> (i32, i32) {
    %c0_i32 = arith.constant 0 : i32
    %c0_i32_0 = arith.constant 0 : i32
    return %c0_i32, %arg0 : i32, i32
  }
  func.func @transform_2(%arg0: i32) -> (i32, i32) {
    %c0_i32 = arith.constant 0 : i32
    %c0_i32_0 = arith.constant 0 : i32
    return %c0_i32, %arg0 : i32, i32
  }
  func.func @transform_3(%arg0: i32) -> (i32, i32) {
    %c0_i32 = arith.constant 0 : i32
    %c0_i32_0 = arith.constant 0 : i32
    return %c0_i32, %arg0 : i32, i32
  }
  func.func @transform_4(%arg0: i32) -> (i32, i32) {
    %c0_i32 = arith.constant 0 : i32
    %c0_i32_0 = arith.constant 0 : i32
    return %c0_i32, %arg0 : i32, i32
  }
}

</mosaic_0001>

<bundles_post_ra>
// kernel: tpu_custom_call.1
= control target key start
LH: loop header
LB: loop body
LE: loop exit
PB: predicated region body
PF: predicated region fallthrough
CT: control target
= control target key end

     0   :  { %9 = vsyncpa [#allocation3], 0  ;;  %s962_s0 = inlined_call_operand.hbm [shape: f32[16,32], index: 0, kind: input, shape index: {}]   ;;  %s963_s1 = inlined_call_operand.hbm [shape: f32[32,256], index: 1, kind: input, shape index: {}]   ;;  %s964_s2 = inlined_call_operand.vmem [shape: f32[1,256], index: 2, kind: input, shape index: {}]   ;;  %s965_s3 = inlined_call_operand.vmem [shape: f32[1,256], index: 3, kind: input, shape index: {}]   ;;  %s966_s4 = inlined_call_operand.hbm [shape: bf16[16,256], index: 4, kind: output, shape index: {}]  }
   0x1   :  { %10 = vsyncpa [#allocation6], 0 }
   0x2   :  { %12 = vsyncpa [#allocation6 + $0x1], 0 }
   0x3   :  { %13 = vsyncpa [#allocation4], 0 }
   0x4   :  { %15 = vsyncpa [#allocation4 + $0x1], 0  ;;  %s765_s15 = smov 0   ;;  %s767_s16 = smov 0  }
   0x5   :  { %s769_s17 = smov 0   ;;  %s771_s18 = smov 0  }
   0x6 LB: > { %s786_s19 = sadd.s32 4294967295, %s727_s18   ;;  %s506_s20 = sadd.s32 4294967294, %s727_s18   ;;  %s727_s18 = sphi %s771_s18, %s988_s18   ;;  %s723_s17 = sphi %s769_s17, %s987_s17   ;;  %s719_s16 = sphi %s767_s16, %s986_s16   ;;  %s715_s15 = sphi %s765_s15, %s985_s15  }
   0x7   : > { %s790_s21 = sadd.s32 1, %s727_s18   ;;  %s49_s22 = sadd.s32 1, %s723_s17 }
   0x8   : > { %s46_s23 = ssub.s32 %s727_s18, %s790_s21  ;;  %p56_p0 = scmp.ne.s32.totalorder %s723_s17, %s719_s16 }
   0x9   : > { %p47_p1 = scmp.eq.s32.totalorder %s46_s23, 0  ;;  %p57_p2 = scmp.eq.s32.totalorder %s727_s18, 0 }
   0xa   : > { %p62_p3 = scmp.ne.s32.totalorder %s719_s16, %s715_s15  ;;  %p970_p4 = scmp.eq.s32.totalorder %s786_s19, 0 }
   0xb   : > { %s802_s24 = scalar_select %p47_p1, %s723_s17, %s49_s22  }
   0xc   : > { %p804_p5 = por %p57_p2, %p56_p0  ;;  %p810_p6 = por %p970_p4, %p62_p3 }
   0xd   : > { %p138_p7 = scmp.eq.s32.totalorder %s786_s19, 1  ;;  %p144_p8 = scmp.eq.s32.totalorder %s506_s20, 1 }
   0xe   : > { %s972_s26 = scalar_select %p810_p6, 1, 0 }
   0xf   : > { %p507_p9 = scmp.ge.s32.totalorder %s727_s18, 1  ;;  %p151_p10 = scmp.lt.s32.totalorder %s727_s18, 3 }
  0x10   : > { %p817_p11 = por %p138_p7, %p56_p0  ;;  %p821_p12 = por %p144_p8, %p62_p3 }
  0x11   : > { %p825_p13 = pnand %p507_p9, %p151_p10  ;;  %s729_s30 = smov [#allocation2]  }
  0x12   : > { %s973_s27 = scalar_select %p817_p11, 1, 0 }
  0x13   : > { %s974_s28 = scalar_select %p821_p12, 1, 0 }
  0x14   : > { %s975_s29 = scalar_select %p825_p13, 1, 0 }
  0x15   : > { %p544_p1 = pneg %p825_p13  ;;  %s163_s5 = sshll.u32 %s729_s30, 4  ;;  %s164_s5 = int_to_ptr.vmem [resolvable:$true] %s163_s5 }
  0x16   : > { %p557_p3 = scmp.lt.s32.totalorder %s727_s18, 2  ;;  %s177_s7 = sand.u32 1, %s723_s17  }
  0x17   : > { %p833_p2 = pnand %p544_p1, %p970_p4  ;;  %s616_s8 = scalar_lea.vmem %s164_s5, 256 }
  0x18   : > { %p617_p8 = scmp.ne.s32.totalorder %s164_s5, %s616_s8  ;;  %p624_p12 = scmp.lt.s32.totalorder %s164_s5, %s164_s5 }
  0x19   : > { %p607_p7 = pneg %p833_p2  ;;  %p625_p11 = scmp.lt.s32.totalorder %s616_s8, %s616_s8 }
  0x1b   : > { %p619_p9 = pnand %p617_p8, %p607_p7  ;;  %p626_p6 = por %p625_p11, %p624_p12 }
  0x1d   : > { %p620_p10 = pneg %p619_p9 }
  0x1f   : > { %p627_p13 = pnand %p626_p6, %p620_p10 }
  0x21   : > { %630 = shalt.err (!%p627_p13)
}
  0x22   : > { %s730_s9 = smov 128   ;;  %s731_s10 = smov 8  }
  0x23   : > { %547 = dma.hbm_to_vmem [thread:$0]  (!%p833_p2), %s962_s0, 256, %s164_s5, [#allocation3], %s730_s9, %s730_s9, %s731_s10  }
  0x24   : > { %p854_p1 = pnand %p557_p3, %p804_p5  ;;  %s510_s14 = sshll.u32 %s177_s7, 5 }
  0x25   : > { %s511_s20 = sshll.u32 %s727_s18, 7  ;;  %s181_s6 = scalar_lea.vmem [#allocation5], %s510_s14 }
  0x26   : > { %s862_s30 = scalar_lea.hbm %s963_s1, %s511_s20  ;;  %s187_s8 = sshll.u32 %s181_s6, 4  ;;  %s864_s8 = int_to_ptr.vmem [resolvable:$true] %s187_s8 }
  0x27   : > { %s866_s25 = scalar_lea.sflag [#allocation6], %s177_s7  ;;  %s631_s5 = scalar_lea.hbm %s862_s30, 512 }
  0x28   : > { %p632_p5 = scmp.ne.s32.totalorder %s862_s30, %s631_s5  ;;  %p633_p6 = pneg %p854_p1 }
  0x29   : > { %s636_s20 = scalar_lea.hbm %s963_s1, 1024  ;;  %p637_p13 = scmp.lt.s32.totalorder %s862_s30, %s963_s1 }
  0x2a   : > { %p634_p11 = pnand %p633_p6, %p632_p5  ;;  %p638_p2 = scmp.lt.s32.totalorder %s636_s20, %s631_s5 }
  0x2c   : > { %p635_p12 = pneg %p634_p11  ;;  %p639_p3 = por %p638_p2, %p637_p13 }
  0x2e   : > { %p640_p7 = pnand %p639_p3, %p635_p12 }
  0x30   : > { %643 = shalt.err (!%p640_p7)
}
  0x31   : > { %s644_s7 = scalar_lea.vmem %s864_s8, 512  ;;  %s732_s14 = smov [#allocation5]  }
  0x32   : > { %p645_p8 = scmp.ne.s32.totalorder %s864_s8, %s644_s7  ;;  %s649_s6 = sshll.u32 %s732_s14, 4  ;;  %s650_s6 = int_to_ptr.vmem [resolvable:$false] %s649_s6 }
  0x33   : > { %s651_s11 = scalar_lea.vmem %s650_s6, 1024  ;;  %p652_p5 = scmp.lt.s32.totalorder %s864_s8, %s650_s6 }
  0x34   : > { %p647_p9 = pnand %p645_p8, %p633_p6  ;;  %p653_p11 = scmp.lt.s32.totalorder %s651_s11, %s644_s7 }
  0x36   : > { %p648_p10 = pneg %p647_p9  ;;  %p654_p0 = por %p653_p11, %p652_p5 }
  0x38   : > { %p655_p4 = pnand %p654_p0, %p648_p10 }
  0x3a   : > { %658 = shalt.err (!%p655_p4)
}
  0x3b   : > { %s733_s5 = smov 256   ;;  %p978_p6 = scmp.ne.s32.totalorder %s975_s29, 0 }
  0x3c   : > { %551 = dma.hbm_to_vmem [thread:$0]  (!%p854_p1), %s862_s30, 512, %s864_s8, %s866_s25, %s733_s5, %s730_s9, %s731_s10  }
  0x3d   : > { %211 = sbr.rel (%p978_p6) target bundleno = 351 (0x15f), region = 36  ;;  %p979_p12 = scmp.eq.s32.totalorder (!%p978_p6), %s786_s19, 0 }
  0x42   : > { %702 = dma.done.wait (%p979_p12), [#allocation3], 256   ;;  %p980_p13 = pmov %p979_p12 }
  0x43   : > { %s896_s12 = sand.u32 1, %s719_s16   ;;  %p981_p4 = scmp.ne.s32.totalorder %s972_s26, 0 }
  0x44   : > { %704 = vsyncadd (%p980_p13), [#allocation3], 4294967040  ;;  %s514_s13 = sshll.u32 %s896_s12, 5  ;;  %s218_s20 = scalar_lea.sflag [#allocation6], %s896_s12 }
  0x45   : > { %s221_s22 = scalar_lea.vmem [#allocation5], %s514_s13 }
  0x46   : > { %706 = dma.done.wait (%p981_p4), %s218_s20, 512  }
  0x47   : > { %708 = vsyncadd (%p981_p4), %s218_s20, 4294966784  ;;  %v734_v0 = vmov 0.0   ;;  %vm735_vm0 = vmmov 0   ;;  %v264_v1 = vld [vmem:[%s221_s22 + $0x10] sm:$0xff]  ;;  %v265_v2 = vld [vmem:[%s221_s22 + $0x18] sm:$0xff]  ;;  %vm268_vm1 = vcmask 261120  }
  0x48   : > { %528 = vmatprep.subr.bf16.mxu0 %v734_v0  ;;  %532 = vmatprep.mubr.msk.bf16.mxu0 %vm735_vm0, %v734_v0  ;;  %v262_v3 = vld [vmem:[%s221_s22] sm:$0xff]  ;;  %v267_v4 = vpack.c.bf16 %v265_v2, %v264_v1  ;;  %v263_v5 = vld [vmem:[%s221_s22 + $0x8] sm:$0xff]  ;;  %v259_v7 = vld [vmem:[#allocation2] sm:$0xff]  ;;  %p252_p0 = scmp.lt.s32.totalorder %s786_s19, 1  ;;  %s515_s23 = sshll.u32 %s896_s12, 3 }
  0x49   : > { %v266_v6 = vpack.c.bf16 %v263_v5, %v262_v3  ;;  %v260_v8 = vld [vmem:[#allocation2 + $0x8] sm:$0xff]  ;;  %s522_s7 = sshll.u32 %s786_s19, 6  ;;  %s251_s14 = scalar_lea.vmem [#allocation7], %s515_s23 }
  0x4a   : > { %529 = vmatpush3.bf16.msra.mxu0 %v267_v4  ;;  %v261_v9 = vpack.c.bf16 %v260_v8, %v259_v7  ;;  %s253_s26 = scalar_select %p252_p0, %s786_s19, 1 }
  0x4b   : > { %530 = vmatprep.subr.bf16.mxu0 %v734_v0  ;;  %s403_s6 = sshll.u32 %s251_s14, 4  ;;  %s917_s13 = scalar_lea.hbm %s966_s4, %s522_s7  ;;  %s919_s6 = int_to_ptr.vmem [resolvable:$true] %s403_s6 }
  0x4c   : > { %s254_s10 = scalar_lea.vmem %s964_s2, %s253_s26  ;;  %s257_s25 = scalar_lea.vmem %s965_s3, %s253_s26 }
  0x4d   : > { %v517_v49 = vld [vmem:[%s254_s10] ss:$0 sm:$0xff]  ;;  %s391_s20 = scalar_lea.sflag [#allocation4], %s896_s12  ;;  %s659_s19 = scalar_lea.vmem %s919_s6, 128 }
  0x4e   : > { %531 = vmatpush3.bf16.msra.mxu0 %v266_v6  ;;  %v518_v51 = vld [vmem:[%s257_s25] ss:$0 sm:$0xff]  ;;  %p660_p1 = scmp.ne.s32.totalorder %s919_s6, %s659_s19  ;;  %p982_p2 = scmp.ne.s32.totalorder %s973_s27, 0 }
  0x4f   : > { %s736_s22 = smov [#allocation7]  }
  0x50   : > { %p661_p3 = pnand %p660_p1, %p982_p2  ;;  %s663_s26 = sshll.u32 %s736_s22, 4  ;;  %s664_s26 = int_to_ptr.vmem [resolvable:$false] %s663_s26 }
  0x51   : > { %533 = vmatmul.mubr.msk.bf16.vlgmr.msra.gmra.mxu0 %vm268_vm1, %v261_v9  ;;  %s665_s29 = scalar_lea.vmem %s664_s26, 256  ;;  %p666_p8 = scmp.lt.s32.totalorder %s919_s6, %s664_s26 }
  0x52   : > { %p662_p7 = pneg %p661_p3  ;;  %p667_p9 = scmp.lt.s32.totalorder %s665_s29, %s659_s19 }
  0x54   : > { %p668_p10 = por %p667_p9, %p666_p8 }
  0x56   : > { %p669_p5 = pnand %p668_p10, %p662_p7 }
 0x111   : > { %v306_v10 = vpop.f32.mrf.mxu0 }
 0x112   : > { %v313_v11 = vrot.slane %v306_v10, 4 }
 0x113   : > { %v534_v12 = vpop.f32.mrf.mxu0 }
 0x114   : > { %v314_v13 = vadd.f32 %v313_v11, %v306_v10 }
 0x115   : > { %v309_v14 = vpop.f32.mrf.mxu0 }
 0x116   : > { %v315_v15 = vrot.slane %v314_v13, 2  ;;  %v352_v16 = vrot.slane %v309_v14, 4 }
 0x117   : > { %v535_v17 = vpop.f32.mrf.mxu0 }
 0x118   : > { %v316_v18 = vadd.f32 %v315_v15, %v314_v13  ;;  %v353_v19 = vadd.f32 %v352_v16, %v309_v14 }
 0x11a   : > { %v317_v20 = vrot.slane %v316_v18, 1  ;;  %v354_v21 = vrot.slane %v353_v19, 2 }
 0x11c   : > { %v318_v22 = vadd.f32 %v317_v20, %v316_v18  ;;  %v355_v23 = vadd.f32 %v354_v21, %v353_v19 }
 0x11e   : > { %v320_v24 = vmul.f32 0.125, %v318_v22  ;;  %v356_v25 = vrot.slane %v355_v23, 1 }
 0x120   : > { %v321_v26 = vsub.f32 %v306_v10, %v320_v24  ;;  %v357_v27 = vadd.f32 %v356_v25, %v355_v23 }
 0x122   : > { %v322_v28 = vmul.f32 %v321_v26, %v321_v26  ;;  %v358_v29 = vmul.f32 0.125, %v357_v27 }
 0x124   : > { %v323_v30 = vrot.slane %v322_v28, 4  ;;  %v359_v31 = vsub.f32 %v309_v14, %v358_v29 }
 0x126   : > { %v324_v32 = vadd.f32 %v323_v30, %v322_v28  ;;  %v360_v33 = vmul.f32 %v359_v31, %v359_v31 }
 0x128   : > { %v325_v34 = vrot.slane %v324_v32, 2  ;;  %v361_v35 = vrot.slane %v360_v33, 4 }
 0x12a   : > { %v326_v36 = vadd.f32 %v325_v34, %v324_v32  ;;  %v362_v37 = vadd.f32 %v361_v35, %v360_v33 }
 0x12c   : > { %v327_v38 = vrot.slane %v326_v36, 1  ;;  %v363_v39 = vrot.slane %v362_v37, 2 }
 0x12e   : > { %v328_v40 = vadd.f32 %v327_v38, %v326_v36  ;;  %v364_v41 = vadd.f32 %v363_v39, %v362_v37 }
 0x130   : > { %v329_v42 = vmul.f32 0.125, %v328_v40  ;;  %v365_v43 = vrot.slane %v364_v41, 1 }
 0x132   : > { %v330_v44 = vadd.f32 1e-05, %v329_v42  ;;  %v366_v45 = vadd.f32 %v365_v43, %v364_v41 }
 0x134   : > { %601 = vrsqrt.f32 %v330_v44  ;;  %v367_v46 = vmul.f32 0.125, %v366_v45 }
 0x136   : > { %v368_v47 = vadd.f32 1e-05, %v367_v46 }
 0x138   : > { %603 = vrsqrt.f32 %v368_v47 }
 0x141   : > { %v602_v48 = vpop.eup %601 }
 0x142   : > { %v332_v50 = vmul.f32 %v602_v48, %v321_v26 }
 0x144   : > { %v340_v52 = vmul.f32 %v517_v49, %v332_v50 }
 0x145   : > { %v604_v53 = vpop.eup %603 }
 0x146   : > { %v348_v54 = vadd.f32 %v518_v51, %v340_v52  ;;  %v370_v55 = vmul.f32 %v604_v53, %v359_v31 }
 0x148   : > { %v349_v56 = vmax.f32 %v348_v54, 0.0  ;;  %v378_v57 = vmul.f32 %v517_v49, %v370_v55 }
 0x14a   : > { %v350_v58 = vpack.c.bf16 %v349_v56, %v349_v56  ;;  %v386_v59 = vadd.f32 %v518_v51, %v378_v57 }
 0x14c   : > { %351 = vst [vmem:[%s251_s14] sm:$0xf] %v350_v58  ;;  %v387_v60 = vmax.f32 %v386_v59, 0.0 }
 0x14e   : > { %v388_v61 = vpack.c.bf16 %v387_v60, %v387_v60 }
 0x150   : > { %389 = vst [vmem:[%s251_s14 + $0x4] sm:$0xf] %v388_v61 }
 0x151   : > { %672 = shalt.err (!%p669_p5)
}
 0x152   : > { %s673_s9 = scalar_lea.hbm %s917_s13, 128  ;;  %s677_s8 = scalar_lea.hbm %s966_s4, 256 }
 0x153   : > { %p674_p11 = scmp.ne.s32.totalorder %s917_s13, %s673_s9  ;;  %p678_p13 = scmp.lt.s32.totalorder %s917_s13, %s966_s4 }
 0x154   : > { %p679_p4 = scmp.lt.s32.totalorder %s677_s8, %s673_s9 }
 0x155   : > { %p675_p6 = pnand %p674_p11, %p982_p2 }
 0x156   : > { %p680_p0 = por %p679_p4, %p678_p13 }
 0x157   : > { %p676_p12 = pneg %p675_p6 }
 0x159   : > { %p681_p1 = pnand %p680_p0, %p676_p12 }
 0x15b   : > { %684 = shalt.err (!%p681_p1)
}
 0x15c   : > { %s737_s7 = smov 64   ;;  %s738_s14 = smov 128  }
 0x15d   : > { %s739_s11 = smov 4  }
 0x15e   : > { %542 = dma.vmem_to_hbm [thread:$0]  (%p982_p2), %s919_s6, 128, %s917_s13, %s391_s20, %s737_s7, %s738_s14, %s739_s11  }
 0x15f PF: > { %s418_s5 = sand.u32 1, %s715_s15   ;;  %p983_p3 = scmp.ne.s32.totalorder %s974_s28, 0 }
 0x160   : > { %p984_p7 = scmp.ge.s32.totalorder %s727_s18, 2  ;;  %s419_s19 = scalar_lea.sflag [#allocation4], %s418_s5 }
 0x162   : > { %p553_p8 = pnand %p984_p7, %p983_p3 }
 0x164   : > { %p554_p9 = pneg %p553_p8 }
 0x166   : > { %710 = dma.done.wait (%p554_p9), %s419_s19, 128  }
 0x167   : > { %712 = vsyncadd (%p554_p9), %s419_s19, 4294967168  ;;  %p18_p10 = scmp.ge.s32.totalorder %s790_s21, 4   ;;  %s985_s15 = smov %s719_s16 }
 0x168   : > { %s986_s16 = smov %s723_s17  ;;  %s987_s17 = smov %s802_s24 }
 0x169   : > { %s988_s18 = smov %s790_s21  ;;  %20 = sbr.rel (!%p18_p10) target bundleno = 6 (0x6), region = 92 }
 0x16e   :  { %424 = vsyncpa [#allocation3], 1 }
 0x16f   :  { %426 = vsyncpa [#allocation3 + $0x1], 1 }
 0x170   :  { %427 = vsyncpa [#allocation6], 1 }
 0x171   :  { %429 = vsyncpa [#allocation6 + $0x1], 1 }
 0x172   :  { %430 = vsyncpa [#allocation4], 1 }
 0x173   :  { %432 = vsyncpa [#allocation4 + $0x1], 1 }

</bundles_post_ra>
